<compile_context>
chip_gen: v5e
topology: v5e:2x2
jax: 0.10.0
libtpu: 0.0.40
codegen_flags: <defaults>
</compile_context>

<pallas_src>
import jax
import jax.numpy as jnp
from jax.experimental import pallas as pl
from jax.experimental.pallas import tpu as pltpu

LANE = 128


def _round_up(n, m):
    return ((n + m - 1) // m) * m


def _pad2(a, rows, cols, fill=0.0):
    r, c = a.shape
    return jnp.pad(a, ((0, rows - r), (0, cols - c)), constant_values=fill)


def _mlp_softmax_kernel(x_ref, w1_ref, b1_ref, w2_ref, b2_ref, w3_ref, b3_ref,
                        o_ref):
    tb, f = x_ref.shape
    fp = w1_ref.shape[0]

    x = x_ref[...]                                      # (TB, F) f32
    if f < fp:                                          # pad features in VMEM only
        x = jnp.concatenate(
            [x, jnp.zeros((tb, fp - f), dtype=x.dtype)], axis=1)

    # hidden1 + ReLU   (all f32; MXU time is hidden under DMA)
    h1 = jnp.dot(x, w1_ref[...], preferred_element_type=jnp.float32) + b1_ref[...]
    h1 = jnp.maximum(h1, 0.0)
    # hidden2 + ReLU
    h2 = jnp.dot(h1, w2_ref[...], preferred_element_type=jnp.float32) + b2_ref[...]
    h2 = jnp.maximum(h2, 0.0)
    # output linear (padded classes carry -1e30 bias -> exp() == 0)
    logits = jnp.dot(h2, w3_ref[...], preferred_element_type=jnp.float32) + b3_ref[...]

    # numerically stable softmax over the class (lane) axis, exact divide
    m = jnp.max(logits, axis=1, keepdims=True)
    e = jnp.exp(logits - m)
    denom = jnp.sum(e, axis=1, keepdims=True)
    probs = e / denom

    # compact store: only the real classes leave the kernel
    o_ref[...] = probs[:, :o_ref.shape[1]].astype(o_ref.dtype)


def _prepare_params(params):
    """Pad weights/biases to lane multiples; everything stays f32."""
    w1, b1, w2, b2, w3, b3 = params
    F, H1 = w1.shape
    H2 = w2.shape[1]
    O = w3.shape[1]
    Fp, H1p, H2p, Op = (_round_up(d, LANE) for d in (F, H1, H2, O))

    w1p = _pad2(w1.astype(jnp.float32), Fp, H1p)
    b1p = _pad2(b1.astype(jnp.float32), 1, H1p)      # zero pad -> padded h1 cols = 0
    w2p = _pad2(w2.astype(jnp.float32), H1p, H2p)
    b2p = _pad2(b2.astype(jnp.float32), 1, H2p)
    w3p = _pad2(w3.astype(jnp.float32), H2p, Op)
    b3p = _pad2(b3.astype(jnp.float32), 1, Op, fill=-1e30)  # padded classes ~ -inf
    return (w1p, b1p, w2p, b2p, w3p, b3p), (F, O)


def net_test(x, params, batch_tile=2048):
    """Equivalent of NET.test(x): forward (3 Linear + 2 ReLU) + Softmax(dim=1)."""
    (w1p, b1p, w2p, b2p, w3p, b3p), (F, O) = _prepare_params(params)

    B = x.shape[0]
    TB = min(batch_tile, _round_up(B, 8))   # sublane-multiple batch tile
    grid = (pl.cdiv(B, TB),)                # partial last block is masked by Pallas
    const = lambda i: (0, 0)                # weights/biases resident across steps

    out = pl.pallas_call(
        _mlp_softmax_kernel,
        out_shape=jax.ShapeDtypeStruct((B, O), jnp.float32),
        grid=grid,
        in_specs=[
            pl.BlockSpec((TB, F), lambda i: (i, 0)),   # x streamed, no HBM padding
            pl.BlockSpec(w1p.shape, const),
            pl.BlockSpec(b1p.shape, const),
            pl.BlockSpec(w2p.shape, const),
            pl.BlockSpec(b2p.shape, const),
            pl.BlockSpec(w3p.shape, const),
            pl.BlockSpec(b3p.shape, const),
        ],
        out_specs=pl.BlockSpec((TB, O), lambda i: (i, 0)),  # compact output
        compiler_params=pltpu.CompilerParams(
            dimension_semantics=("parallel",),
            vmem_limit_bytes=32 * 1024 * 1024),
    )(x, w1p, b1p, w2p, b2p, w3p, b3p)

    return out


def net_test_ref(x, params):
    """Pure-JAX f32 reference of NET.test."""
    w1, b1, w2, b2, w3, b3 = params
    h1 = jnp.maximum(x @ w1 + b1, 0.0)
    h2 = jnp.maximum(h1 @ w2 + b2, 0.0)
    logits = h2 @ w3 + b3
    return jax.nn.softmax(logits, axis=1)


def init_params(key, n_feature, n_hidden1, n_hidden2, n_output):
    """Deterministic init mimicking nn.Linear default (U[-1/sqrt(fan_in), +])."""
    def linear(key, fan_in, fan_out):
        kw, kb = jax.random.split(key)
        bound = 1.0 / jnp.sqrt(jnp.float32(fan_in))
        # stored as (in, out) so the kernel does x @ W
        w = jax.random.uniform(kw, (fan_in, fan_out), jnp.float32, -bound, bound)
        b = jax.random.uniform(kb, (1, fan_out), jnp.float32, -bound, bound)
        return w, b

    k1, k2, k3 = jax.random.split(key, 3)
    w1, b1 = linear(k1, n_feature, n_hidden1)
    w2, b2 = linear(k2, n_hidden1, n_hidden2)
    w3, b3 = linear(k3, n_hidden2, n_output)
    return (w1, b1, w2, b2, w3, b3)


if __name__ == "__main__":
    # Small shapes consistent with the module: tabular input (B, n_feature),
    # hidden sizes 32 and 20 as in the original script, n_output = #classes.
    B, n_feature, n_hidden1, n_hidden2, n_output = 8, 16, 32, 20, 4

    key = jax.random.PRNGKey(0)
    kx, kx2, kp = jax.random.split(key, 3)
    x = jax.random.normal(kx, (B, n_feature), jnp.float32)
    params = init_params(kp, n_feature, n_hidden1, n_hidden2, n_output)

    y = net_test(x, params)
    jax.block_until_ready(y)

    assert y.shape == (B, n_output)
    # exact divide -> rows sum to 1 within f32 rounding
    assert jnp.allclose(jnp.sum(y, axis=1), 1.0, atol=1e-4)
    # match the f32 reference (tolerance covers MXU accumulation-order diffs)
    y_ref = net_test_ref(x, params)
    assert jnp.allclose(y, y_ref, atol=2e-2), float(jnp.max(jnp.abs(y - y_ref)))

    # multi-step grid + partial (masked) last block check
    B2 = 20
    x2 = jax.random.normal(kx2, (B2, n_feature), jnp.float32)
    y2 = net_test(x2, params, batch_tile=8)
    jax.block_until_ready(y2)
    assert y2.shape == (B2, n_output)
    y2_ref = net_test_ref(x2, params)
    assert jnp.allclose(y2, y2_ref, atol=2e-2), float(jnp.max(jnp.abs(y2 - y2_ref)))

    print("KERNEL_OK")
</pallas_src>

<mosaic_0001>
module attributes {stable_mosaic.version = 11 : i64} {
  func.func @_mlp_softmax_kernel(%arg0: i32, %arg1: memref<8x16xf32, #tpu.memory_space<vmem>>, %arg2: memref<128x128xf32, #tpu.memory_space<vmem>>, %arg3: memref<1x128xf32, #tpu.memory_space<vmem>>, %arg4: memref<128x128xf32, #tpu.memory_space<vmem>>, %arg5: memref<1x128xf32, #tpu.memory_space<vmem>>, %arg6: memref<128x128xf32, #tpu.memory_space<vmem>>, %arg7: memref<1x128xf32, #tpu.memory_space<vmem>>, %arg8: memref<8x4xf32, #tpu.memory_space<vmem>>) attributes {dimension_semantics = [#tpu.dimension_semantics<parallel>], iteration_bounds = array<i64: 1>, scalar_prefetch = 0 : i64, scratch_operands = 0 : i64, tpu.core_type = #tpu.core_type<tc>, window_params = [{transform_indices = @transform_0, window_bounds = array<i64: 8, 16>}, {pipeline_mode = #tpu.pipeline_mode<synchronous>, transform_indices = @transform_1, window_bounds = array<i64: 128, 128>}, {pipeline_mode = #tpu.pipeline_mode<synchronous>, transform_indices = @transform_2, window_bounds = array<i64: 1, 128>}, {pipeline_mode = #tpu.pipeline_mode<synchronous>, transform_indices = @transform_3, window_bounds = array<i64: 128, 128>}, {pipeline_mode = #tpu.pipeline_mode<synchronous>, transform_indices = @transform_4, window_bounds = array<i64: 1, 128>}, {pipeline_mode = #tpu.pipeline_mode<synchronous>, transform_indices = @transform_5, window_bounds = array<i64: 128, 128>}, {pipeline_mode = #tpu.pipeline_mode<synchronous>, transform_indices = @transform_6, window_bounds = array<i64: 1, 128>}, {transform_indices = @transform_7, window_bounds = array<i64: 8, 4>}]} {
    %c0 = arith.constant 0 : index
    %c0_0 = arith.constant 0 : index
    %0 = vector.load %arg1[%c0, %c0_0] : memref<8x16xf32, #tpu.memory_space<vmem>>, vector<8x16xf32>
    %cst = arith.constant 0.000000e+00 : f32
    %1 = vector.broadcast %cst : f32 to vector<8x112xf32>
    %2 = tpu.concatenate %0, %1 in 1 : vector<8x16xf32>, vector<8x112xf32> -> vector<8x128xf32>
    %c0_1 = arith.constant 0 : index
    %c0_2 = arith.constant 0 : index
    %3 = vector.load %arg2[%c0_1, %c0_2] : memref<128x128xf32, #tpu.memory_space<vmem>>, vector<128x128xf32>
    %cst_3 = arith.constant dense<0.000000e+00> : vector<8x128xf32>
    %4 = tpu.matmul %2, %3, %cst_3 {dimension_numbers = #tpu.dot_dimension_numbers<[1], [0], [0], [1], [0, 0, 1, 1], [], []>} : vector<8x128xf32>, vector<128x128xf32>, vector<8x128xf32> -> vector<8x128xf32>
    %c0_4 = arith.constant 0 : index
    %c0_5 = arith.constant 0 : index
    %5 = vector.load %arg3[%c0_4, %c0_5] : memref<1x128xf32, #tpu.memory_space<vmem>>, vector<1x128xf32>
    %6 = vector.broadcast %5 : vector<1x128xf32> to vector<8x128xf32>
    %7 = arith.addf %4, %6 : vector<8x128xf32>
    %cst_6 = arith.constant 0.000000e+00 : f32
    %8 = vector.broadcast %cst_6 : f32 to vector<8x128xf32>
    %9 = arith.maximumf %7, %8 : vector<8x128xf32>
    %c0_7 = arith.constant 0 : index
    %c0_8 = arith.constant 0 : index
    %10 = vector.load %arg4[%c0_7, %c0_8] : memref<128x128xf32, #tpu.memory_space<vmem>>, vector<128x128xf32>
    %cst_9 = arith.constant dense<0.000000e+00> : vector<8x128xf32>
    %11 = tpu.matmul %9, %10, %cst_9 {dimension_numbers = #tpu.dot_dimension_numbers<[1], [0], [0], [1], [0, 0, 1, 1], [], []>} : vector<8x128xf32>, vector<128x128xf32>, vector<8x128xf32> -> vector<8x128xf32>
    %c0_10 = arith.constant 0 : index
    %c0_11 = arith.constant 0 : index
    %12 = vector.load %arg5[%c0_10, %c0_11] : memref<1x128xf32, #tpu.memory_space<vmem>>, vector<1x128xf32>
    %13 = vector.broadcast %12 : vector<1x128xf32> to vector<8x128xf32>
    %14 = arith.addf %11, %13 : vector<8x128xf32>
    %cst_12 = arith.constant 0.000000e+00 : f32
    %15 = vector.broadcast %cst_12 : f32 to vector<8x128xf32>
    %16 = arith.maximumf %14, %15 : vector<8x128xf32>
    %c0_13 = arith.constant 0 : index
    %c0_14 = arith.constant 0 : index
    %17 = vector.load %arg6[%c0_13, %c0_14] : memref<128x128xf32, #tpu.memory_space<vmem>>, vector<128x128xf32>
    %cst_15 = arith.constant dense<0.000000e+00> : vector<8x128xf32>
    %18 = tpu.matmul %16, %17, %cst_15 {dimension_numbers = #tpu.dot_dimension_numbers<[1], [0], [0], [1], [0, 0, 1, 1], [], []>} : vector<8x128xf32>, vector<128x128xf32>, vector<8x128xf32> -> vector<8x128xf32>
    %c0_16 = arith.constant 0 : index
    %c0_17 = arith.constant 0 : index
    %19 = vector.load %arg7[%c0_16, %c0_17] : memref<1x128xf32, #tpu.memory_space<vmem>>, vector<1x128xf32>
    %20 = vector.broadcast %19 : vector<1x128xf32> to vector<8x128xf32>
    %21 = arith.addf %18, %20 : vector<8x128xf32>
    %cst_18 = arith.constant dense<0xFF800000> : vector<8xf32>
    %22 = vector.multi_reduction <maximumf>, %21, %cst_18 [1] : vector<8x128xf32> to vector<8xf32>
    %23 = vector.shape_cast %22 : vector<8xf32> to vector<8x1xf32>
    %24 = vector.broadcast %23 : vector<8x1xf32> to vector<8x128xf32>
    %25 = arith.subf %21, %24 : vector<8x128xf32>
    %26 = math.exp %25 : vector<8x128xf32>
    %cst_19 = arith.constant dense<0.000000e+00> : vector<8xf32>
    %27 = vector.multi_reduction <add>, %26, %cst_19 [1] : vector<8x128xf32> to vector<8xf32>
    %28 = vector.shape_cast %27 : vector<8xf32> to vector<8x1xf32>
    %29 = vector.broadcast %28 : vector<8x1xf32> to vector<8x128xf32>
    %30 = arith.divf %26, %29 : vector<8x128xf32>
    %31 = vector.extract_strided_slice %30 {offsets = [0, 0], sizes = [8, 4], strides = [1, 1]} : vector<8x128xf32> to vector<8x4xf32>
    %c0_20 = arith.constant 0 : index
    %c0_21 = arith.constant 0 : index
    %32 = vector.load %arg8[%c0_20, %c0_21] : memref<8x4xf32, #tpu.memory_space<vmem>>, vector<8x4xf32>
    tpu.vector_store %arg8[%c0_20, %c0_21], %31 {strides = array<i32>} : memref<8x4xf32, #tpu.memory_space<vmem>>, vector<8x4xf32>,
    return
  }
  func.func @transform_0(%arg0: i32) -> (i32, i32) {
    %c0_i32 = arith.constant 0 : i32
    %c0_i32_0 = arith.constant 0 : i32
    return %arg0, %c0_i32 : i32, i32
  }
  func.func @transform_1(%arg0: i32) -> (i32, i32) {
    %c0_i32 = arith.constant 0 : i32
    %c0_i32_0 = arith.constant 0 : i32
    %c0_i32_1 = arith.constant 0 : i32
    return %c0_i32, %c0_i32_0 : i32, i32
  }
  func.func @transform_2(%arg0: i32) -> (i32, i32) {
    %c0_i32 = arith.constant 0 : i32
    %c0_i32_0 = arith.constant 0 : i32
    %c0_i32_1 = arith.constant 0 : i32
    return %c0_i32, %c0_i32_0 : i32, i32
  }
  func.func @transform_3(%arg0: i32) -> (i32, i32) {
    %c0_i32 = arith.constant 0 : i32
    %c0_i32_0 = arith.constant 0 : i32
    %c0_i32_1 = arith.constant 0 : i32
    return %c0_i32, %c0_i32_0 : i32, i32
  }
  func.func @transform_4(%arg0: i32) -> (i32, i32) {
    %c0_i32 = arith.constant 0 : i32
    %c0_i32_0 = arith.constant 0 : i32
    %c0_i32_1 = arith.constant 0 : i32
    return %c0_i32, %c0_i32_0 : i32, i32
  }
  func.func @transform_5(%arg0: i32) -> (i32, i32) {
    %c0_i32 = arith.constant 0 : i32
    %c0_i32_0 = arith.constant 0 : i32
    %c0_i32_1 = arith.constant 0 : i32
    return %c0_i32, %c0_i32_0 : i32, i32
  }
  func.func @transform_6(%arg0: i32) -> (i32, i32) {
    %c0_i32 = arith.constant 0 : i32
    %c0_i32_0 = arith.constant 0 : i32
    %c0_i32_1 = arith.constant 0 : i32
    return %c0_i32, %c0_i32_0 : i32, i32
  }
  func.func @transform_7(%arg0: i32) -> (i32, i32) {
    %c0_i32 = arith.constant 0 : i32
    %c0_i32_0 = arith.constant 0 : i32
    return %arg0, %c0_i32 : i32, i32
  }
}

</mosaic_0001>

<bundles_post_ra>
// kernel: tpu_custom_call.1
= control target key start
LH: loop header
LB: loop body
LE: loop exit
PB: predicated region body
PF: predicated region fallthrough
CT: control target
= control target key end

     0   :  { %12 = vsyncpa [#allocation3], 0  ;;  %s429_s0 = inlined_call_operand.hbm [shape: f32[8,16], index: 0, kind: input, shape index: {}]   ;;  %s430_s1 = inlined_call_operand.hbm [shape: f32[128,128], index: 1, kind: input, shape index: {}]   ;;  %s431_s2 = inlined_call_operand.vmem [shape: f32[1,128], index: 2, kind: input, shape index: {}]   ;;  %s432_s3 = inlined_call_operand.hbm [shape: f32[128,128], index: 3, kind: input, shape index: {}]   ;;  %s433_s4 = inlined_call_operand.vmem [shape: f32[1,128], index: 4, kind: input, shape index: {}]   ;;  %s434_s5 = inlined_call_operand.hbm [shape: f32[128,128], index: 5, kind: input, shape index: {}]   ;;  %s435_s6 = inlined_call_operand.vmem [shape: f32[1,128], index: 6, kind: input, shape index: {}]   ;;  %s436_s7 = inlined_call_operand.vmem [shape: f32[8,4], index: 7, kind: output, shape index: {}]  }
   0x1   :  { %13 = vsyncpa [#allocation5], 0  ;;  %s30_s26 = sshll.u32 %s430_s1, 4  ;;  %s31_s26 = int_to_ptr.hbm [resolvable:$true] %s30_s26 }
   0x2   :  { %14 = vsyncpa [#allocation8], 0  ;;  %s359_s27 = smov [#allocation4]   ;;  %s20_s8 = sshll.u32 %s429_s0, 4  ;;  %s21_s8 = int_to_ptr.hbm [resolvable:$true] %s20_s8 }
   0x3   :  { %s32_s28 = sshll.u32 %s359_s27, 4  ;;  %s360_s9 = smov 128   ;;  %s33_s28 = int_to_ptr.vmem [resolvable:$true] %s32_s28 }
   0x4   :  { %s361_s10 = smov 8   ;;  %s362_s11 = smov [#allocation2]  }
   0x5   :  { %38 = dma.hbm_to_vmem [thread:$0]  %s31_s26, 2048, %s33_s28, [#allocation5], %s360_s9, %s360_s9, %s361_s10  }
   0x6   :  { %s22_s12 = sshll.u32 %s362_s11, 4  ;;  %s45_s15 = sshll.u32 %s432_s3, 4  ;;  %s23_s12 = int_to_ptr.vmem [resolvable:$true] %s22_s12  ;;  %s46_s15 = int_to_ptr.hbm [resolvable:$true] %s45_s15 }
   0x7   :  { %25 = dma.hbm_to_vmem [thread:$0]  %s21_s8, 128, %s23_s12, [#allocation3]  }
   0x8   :  { %s60_s17 = sshll.u32 %s434_s5, 4  ;;  %s363_s18 = smov [#allocation6]   ;;  %s61_s17 = int_to_ptr.hbm [resolvable:$true] %s60_s17 }
   0x9   :  { %s47_s19 = sshll.u32 %s363_s18, 4  ;;  %s364_s0 = smov [#allocation7]   ;;  %s48_s19 = int_to_ptr.vmem [resolvable:$true] %s47_s19 }
   0xa   :  { %53 = dma.hbm_to_vmem [thread:$0]  %s46_s15, 2048, %s48_s19, [#allocation5], %s360_s9, %s360_s9, %s361_s10  }
   0xb   :  { %s62_s20 = sshll.u32 %s364_s0, 4  ;;  %s63_s20 = int_to_ptr.vmem [resolvable:$true] %s62_s20 }
   0xc   :  { %68 = dma.hbm_to_vmem [thread:$0]  %s61_s17, 2048, %s63_s20, [#allocation8], %s360_s9, %s360_s9, %s361_s10  }
   0xd   :  { %353 = dma.done.wait [#allocation3], 128  }
   0xe   :  { %354 = vsyncadd [#allocation3], 4294967168 }
   0xf   :  { %355 = dma.done.wait [#allocation5], 4096  }
  0x10   :  { %356 = vsyncadd [#allocation5], 4294963200 }
  0x11   :  { %357 = dma.done.wait [#allocation8], 2048  }
  0x12   :  { %358 = vsyncadd [#allocation8], 4294965248  ;;  %v105_v0 = vld [vmem:[#allocation4 + $0x78] sm:$0xff]  ;;  %v104_v1 = vld [vmem:[#allocation4 + $0x70] sm:$0xff]  ;;  %vm88_vm0 = vcmask 130048   ;;  %vm234_vm5 = vcmask 31744  }
  0x13   :  { %110 = vmatpush.msra.mxu0 %v105_v0  ;;  %v103_v2 = vld [vmem:[#allocation4 + $0x68] sm:$0xff]  ;;  %v102_v3 = vld [vmem:[#allocation4 + $0x60] sm:$0xff]  ;;  %v146_v4 = vld [vmem:[#allocation6 + $0x78] sm:$0xff] }
  0x14   :  { %v101_v5 = vld [vmem:[#allocation4 + $0x58] sm:$0xff]  ;;  %151 = vmatpush.msra.mxu1 %v146_v4  ;;  %v145_v6 = vld [vmem:[#allocation6 + $0x70] sm:$0xff]  ;;  %v144_v7 = vld [vmem:[#allocation6 + $0x68] sm:$0xff] }
  0x15   :  { %111 = vmatpush.msra.mxu0 %v104_v1  ;;  %v100_v8 = vld [vmem:[#allocation4 + $0x50] sm:$0xff]  ;;  %v143_v9 = vld [vmem:[#allocation6 + $0x60] sm:$0xff]  ;;  %v99_v10 = vld [vmem:[#allocation4 + $0x48] sm:$0xff] }
  0x16   :  { %152 = vmatpush.msra.mxu1 %v145_v6  ;;  %v142_v11 = vld [vmem:[#allocation6 + $0x58] sm:$0xff]  ;;  %v98_v12 = vld [vmem:[#allocation4 + $0x40] sm:$0xff]  ;;  %v141_v13 = vld [vmem:[#allocation6 + $0x50] sm:$0xff] }
  0x17   :  { %112 = vmatpush.msra.mxu0 %v103_v2  ;;  %v97_v14 = vld [vmem:[#allocation4 + $0x38] sm:$0xff]  ;;  %v140_v15 = vld [vmem:[#allocation6 + $0x48] sm:$0xff]  ;;  %v96_v16 = vld [vmem:[#allocation4 + $0x30] sm:$0xff] }
  0x18   :  { %153 = vmatpush.msra.mxu1 %v144_v7  ;;  %v139_v17 = vld [vmem:[#allocation6 + $0x40] sm:$0xff]  ;;  %v95_v18 = vld [vmem:[#allocation4 + $0x28] sm:$0xff]  ;;  %v138_v19 = vld [vmem:[#allocation6 + $0x38] sm:$0xff] }
  0x19   :  { %113 = vmatpush.msra.mxu0 %v102_v3  ;;  %v94_v20 = vld [vmem:[#allocation4 + $0x20] sm:$0xff]  ;;  %v137_v21 = vld [vmem:[#allocation6 + $0x30] sm:$0xff]  ;;  %v93_v22 = vld [vmem:[#allocation4 + $0x18] sm:$0xff] }
  0x1a   :  { %154 = vmatpush.msra.mxu1 %v143_v9  ;;  %v136_v23 = vld [vmem:[#allocation6 + $0x28] sm:$0xff]  ;;  %v92_v24 = vld [vmem:[#allocation4 + $0x10] sm:$0xff]  ;;  %v135_v25 = vld [vmem:[#allocation6 + $0x20] sm:$0xff] }
  0x1b   :  { %114 = vmatpush.msra.mxu0 %v101_v5  ;;  %v91_v26 = vld [vmem:[#allocation4 + $0x8] sm:$0xff]  ;;  %v134_v27 = vld [vmem:[#allocation6 + $0x18] sm:$0xff]  ;;  %v90_v28 = vld [vmem:[#allocation4] sm:$0xff] }
  0x1c   :  { %155 = vmatpush.msra.mxu1 %v142_v11  ;;  %v87_v29 = vld [vmem:[#allocation2] sm:$0xff]  ;;  %v133_v30 = vld [vmem:[#allocation6 + $0x10] sm:$0xff]  ;;  %v132_v31 = vld [vmem:[#allocation6 + $0x8] sm:$0xff] }
  0x1d   :  { %115 = vmatpush.msra.mxu0 %v100_v8  ;;  %v131_v32 = vld [vmem:[#allocation6] sm:$0xff]  ;;  %v187_v33 = vld [vmem:[#allocation7 + $0x78] sm:$0xff]  ;;  %v186_v34 = vld [vmem:[#allocation7 + $0x70] sm:$0xff] }
  0x1e   :  { %156 = vmatpush.msra.mxu1 %v141_v13  ;;  %192 = vmatpush.msra.mxu2 %v187_v33  ;;  %v185_v35 = vld [vmem:[#allocation7 + $0x68] sm:$0xff]  ;;  %v184_v36 = vld [vmem:[#allocation7 + $0x60] sm:$0xff]  ;;  %v183_v37 = vld [vmem:[#allocation7 + $0x58] sm:$0xff] }
  0x1f   :  { %116 = vmatpush.msra.mxu0 %v99_v10  ;;  %v182_v38 = vld [vmem:[#allocation7 + $0x50] sm:$0xff]  ;;  %v181_v39 = vld [vmem:[#allocation7 + $0x48] sm:$0xff]  ;;  %v180_v40 = vld [vmem:[#allocation7 + $0x40] sm:$0xff] }
  0x20   :  { %157 = vmatpush.msra.mxu1 %v140_v15  ;;  %193 = vmatpush.msra.mxu2 %v186_v34  ;;  %v179_v41 = vld [vmem:[#allocation7 + $0x38] sm:$0xff]  ;;  %v178_v42 = vld [vmem:[#allocation7 + $0x30] sm:$0xff]  ;;  %v177_v43 = vld [vmem:[#allocation7 + $0x28] sm:$0xff] }
  0x21   :  { %117 = vmatpush.msra.mxu0 %v98_v12  ;;  %v176_v44 = vld [vmem:[#allocation7 + $0x20] sm:$0xff]  ;;  %v175_v45 = vld [vmem:[#allocation7 + $0x18] sm:$0xff]  ;;  %v174_v50 = vld [vmem:[#allocation7 + $0x10] sm:$0xff] }
  0x22   :  { %158 = vmatpush.msra.mxu1 %v139_v17  ;;  %194 = vmatpush.msra.mxu2 %v185_v35  ;;  %v250_v46 = vld [vmem:[%s431_s2] ss:$0 sm:$0xff]  ;;  %v173_v51 = vld [vmem:[#allocation7 + $0x8] sm:$0xff]  ;;  %v172_v52 = vld [vmem:[#allocation7] sm:$0xff] }
  0x23   :  { %118 = vmatpush.msra.mxu0 %v97_v14  ;;  %v251_v53 = vld [vmem:[%s433_s4] ss:$0 sm:$0xff] }
  0x24   :  { %159 = vmatpush.msra.mxu1 %v138_v19  ;;  %195 = vmatpush.msra.mxu2 %v184_v36  ;;  %v252_v57 = vld [vmem:[%s435_s6] ss:$0 sm:$0xff] }
  0x25   :  { %119 = vmatpush.msra.mxu0 %v96_v16 }
  0x26   :  { %160 = vmatpush.msra.mxu1 %v137_v21  ;;  %196 = vmatpush.msra.mxu2 %v183_v37 }
  0x27   :  { %120 = vmatpush.msra.mxu0 %v95_v18 }
  0x28   :  { %161 = vmatpush.msra.mxu1 %v136_v23  ;;  %197 = vmatpush.msra.mxu2 %v182_v38 }
  0x29   :  { %121 = vmatpush.msra.mxu0 %v94_v20 }
  0x2a   :  { %162 = vmatpush.msra.mxu1 %v135_v25  ;;  %198 = vmatpush.msra.mxu2 %v181_v39 }
  0x2b   :  { %122 = vmatpush.msra.mxu0 %v93_v22 }
  0x2c   :  { %163 = vmatpush.msra.mxu1 %v134_v27  ;;  %199 = vmatpush.msra.mxu2 %v180_v40 }
  0x2d   :  { %123 = vmatpush.msra.mxu0 %v92_v24 }
  0x2e   :  { %164 = vmatpush.msra.mxu1 %v133_v30  ;;  %200 = vmatpush.msra.mxu2 %v179_v41 }
  0x2f   :  { %124 = vmatpush.msra.mxu0 %v91_v26 }
  0x30   :  { %165 = vmatpush.msra.mxu1 %v132_v31  ;;  %201 = vmatpush.msra.mxu2 %v178_v42 }
  0x31   :  { %125 = vmatpush.msra.mxu0 %v90_v28 }
  0x32   :  { %243 = vmatmul.msk.f32.vlgmr.msra.gmra.mxu0 %vm88_vm0, %v87_v29  ;;  %166 = vmatpush.msra.mxu1 %v131_v32 }
  0x33   :  { %202 = vmatpush.msra.mxu2 %v177_v43 }
  0x35   :  { %203 = vmatpush.msra.mxu2 %v176_v44 }
  0x37   :  { %204 = vmatpush.msra.mxu2 %v175_v45 }
  0x39   :  { %205 = vmatpush.msra.mxu2 %v174_v50 }
  0x3b   :  { %206 = vmatpush.msra.mxu2 %v173_v51 }
  0x3d   :  { %207 = vmatpush.msra.mxu2 %v172_v52 }
  0xaf   :  { %v127_v47 = vpop.f32.mrf.mxu0 }
  0xb0   :  { %v128_v48 = vadd.f32 %v250_v46, %v127_v47 }
  0xb2   :  { %v130_v49 = vmax.f32 %v128_v48, 0.0 }
  0xb4   :  { %167 = vmatmul.f32.vlgmr.msra.gmra.mxu1 %v130_v49 }
 0x131   :  { %v168_v54 = vpop.f32.mrf.mxu1 }
 0x132   :  { %v169_v55 = vadd.f32 %v251_v53, %v168_v54 }
 0x134   :  { %v171_v56 = vmax.f32 %v169_v55, 0.0 }
 0x136   :  { %208 = vmatmul.f32.vlgmr.msra.gmra.mxu2 %v171_v56 }
 0x1b9   :  { %v209_v58 = vpop.f32.mrf.mxu2 }
 0x1ba   :  { %v210_v59 = vadd.f32 %v252_v57, %v209_v58 }
 0x1bc   :  { %212 = vmax.xlane.f32.xlu0 %v210_v59 }
 0x22f   :  { %v213_v60 = vpop.xlane.xlu0 %212 }
 0x230   :  { %v214_v61 = vsub.f32 %v210_v59, %v213_v60 }
 0x232   :  { %v215_v62 = vmul.f32 1.442695, %v214_v61 }
 0x234   :  { %253 = vpow2.f32 %v215_v62 }
 0x23a   :  { %v254_v63 = vpop.eup %253 }
 0x23b   :  { %217 = vadd.xlane.f32.xlu0 %v254_v63 }
 0x2ae   :  { %v218_v0 = vpop.xlane.xlu0 %217 }
 0x2af   :  { %255 = vrcp.f32 %v218_v0  ;;  %v230_v4 = vand.u32 2147483648, %v218_v0  ;;  %v228_v6 = vand.u32 2147483647, %v218_v0  ;;  %vm224_vm2 = vweird.f32 %v218_v0 }
 0x2b1   :  { %v231_v8 = vor.u32 1.1754944e-38, %v230_v4  ;;  %vm229_vm4 = vcmp.eq.f32.partialorder %v228_v6, 8.507059e+37 }
 0x2b5   :  { %v256_v1 = vpop.eup %255 }
 0x2b6   :  { %v220_v2 = vmul.f32 %v256_v1, %v218_v0  ;;  %vm225_vm1 = vweird.f32 %v256_v1 }
 0x2b7   :  { %vm226_vm3 = vmor %vm224_vm2, %vm225_vm1 }
 0x2b8   :  { %v221_v3 = vsub.f32 1.0, %v220_v2 }
 0x2ba   :  { %v222_v5 = vmul.f32 %v256_v1, %v221_v3 }
 0x2bc   :  { %v223_v7 = vadd.f32 %v256_v1, %v222_v5 }
 0x2be   :  { %v227_v9 = vsel %vm226_vm3, %v256_v1, %v223_v7 }
 0x2bf   :  { %v232_v10 = vsel %vm229_vm4, %v231_v8, %v227_v9 }
 0x2c0   :  { %v233_v11 = vmul.f32 %v254_v63, %v232_v10 }
 0x2c2   :  { %235 = vst.msk [vmem:[%s436_s7] sm:$0xff] %vm234_vm5, %v233_v11 }
 0x2c3   :  { %240 = vsyncpa [#allocation3], 1 }
 0x2c4   :  { %241 = vsyncpa [#allocation5], 1 }
 0x2c5   :  { %242 = vsyncpa [#allocation8], 1 }

</bundles_post_ra>
